<compile_context>
chip_gen: v7x
topology: tpu7x:2x2x1
jax: 0.10.0
libtpu: 0.0.40
codegen_flags: <defaults>
</compile_context>

<pallas_src>
import jax
import jax.numpy as jnp
from jax import lax
from jax.experimental import pallas as pl
from jax.experimental.pallas import tpu as pltpu

_LN_EPS = 1e-5


# ----------------------------------------------------------------------------
# Kernels
# ----------------------------------------------------------------------------
def _prenorm_linear_full_w_kernel(x_ref, gamma_ref, beta_ref, w_ref, bias_ref,
                                  o_ref):
    # x_ref:      (TM, D_in)     row tile of tokens
    # gamma/beta: (1, D_in)      LayerNorm affine
    # w_ref:      (D_in, D_out)  FULL weight; constant block index -> Pallas
    #                            DMAs it from HBM once for the whole kernel.
    # bias_ref:   (1, D_out)
    # o_ref:      (TM, D_out)
    x = x_ref[...].astype(jnp.float32)
    mean = jnp.mean(x, axis=-1, keepdims=True)
    centered = x - mean
    var = jnp.mean(centered * centered, axis=-1, keepdims=True)
    xhat = centered * lax.rsqrt(var + _LN_EPS)
    normed = (xhat * gamma_ref[...].astype(jnp.float32)
              + beta_ref[...].astype(jnp.float32))
    # MXU matmul: operands in the weight's dtype (bf16 on real models),
    # f32 accumulation.
    y = jnp.dot(normed.astype(w_ref.dtype), w_ref[...],
                preferred_element_type=jnp.float32)
    y = y + bias_ref[...].astype(jnp.float32)
    o_ref[...] = y.astype(o_ref.dtype)


def _prenorm_linear_tiled_kernel(x_ref, gamma_ref, beta_ref, w_ref, bias_ref,
                                 o_ref, normed_ref):
    # CORRECTNESS INVARIANT: j (output-feature tiles) must be the INNERMOST
    # grid axis and x's block index (i, 0) must be constant across j; otherwise
    # the j == 0 cache below would reuse a stale normed_ref from the previous
    # row tile.  Do not reorder the grid axes.
    j = pl.program_id(1)

    @pl.when(j == 0)
    def _():
        # LayerNorm statistics in f32; cached once per row tile.
        x = x_ref[...].astype(jnp.float32)
        mean = jnp.mean(x, axis=-1, keepdims=True)
        centered = x - mean
        var = jnp.mean(centered * centered, axis=-1, keepdims=True)
        xhat = centered * lax.rsqrt(var + _LN_EPS)
        normed = (xhat * gamma_ref[...].astype(jnp.float32)
                  + beta_ref[...].astype(jnp.float32))
        normed_ref[...] = normed.astype(normed_ref.dtype)

    y = jnp.dot(normed_ref[...], w_ref[...], preferred_element_type=jnp.float32)
    y = y + bias_ref[...].astype(jnp.float32)
    o_ref[...] = y.astype(o_ref.dtype)


# ----------------------------------------------------------------------------
# Tile / VMEM configuration
# ----------------------------------------------------------------------------
def _round_up(x, m):
    return ((x + m - 1) // m) * m


def _vmem_budget_bytes():
    # ~80% of per-core VMEM: ~51 MiB on v7x (64 MiB/TC), ~102 MiB on v5e/v6e
    # (128 MiB).  Leaves headroom for Mosaic internal scratch / double buffers.
    cap = 64 * 1024 * 1024  # conservative fallback = v7x per-TensorCore VMEM
    try:
        info = pltpu.get_tpu_info()
        c = getattr(info, "vmem_capacity_bytes", None)
        if c:
            cap = int(c)
    except Exception:
        pass
    return int(cap * 0.8)


def _vmem_estimate(tm, tn, d_in, d_out_p, x_itemsize, w_itemsize, out_itemsize,
                   full_w):
    b = 2 * tm * d_in * x_itemsize            # x tile (double-buffered)
    b += 3 * tm * d_in * 4                    # f32 LayerNorm temporaries
    b += tm * d_in * w_itemsize               # normed tile (value / scratch)
    if full_w:
        # Resident W: constant block index => one DMA, but 2 buffers allocated
        # by default (see TODO(synk) in the header about pl.Buffered(1)).
        b += 2 * d_in * d_out_p * w_itemsize
        b += 2 * tm * d_out_p * out_itemsize
    else:
        b += 2 * d_in * tn * w_itemsize       # W column tile (double-buffered)
        b += 2 * tm * tn * out_itemsize
    b += 8 * (d_in + d_out_p) * 4             # gamma/beta/bias (noise)
    return b


def _choose_config(rows, d_in, d_out_p, x_itemsize, w_itemsize, out_itemsize,
                   budget, tile_rows, tile_cols, allow_full_weight):
    # Row-tile candidates: 1024 for bf16 inputs, capped at 512 for f32 (keeps
    # the f32 LayerNorm temporaries inside the v7x budget).  All 128-aligned.
    if x_itemsize <= 2:
        row_cands = (1024, 512, 256, 128)
    else:
        row_cands = (512, 256, 128)
    if tile_rows is not None:
        row_cands = (tile_rows,)
    else:
        row_cands = tuple(t for t in row_cands if t <= rows) or (rows,)

    # Path 1: full-W residency -- W streamed from HBM exactly once.
    if allow_full_weight and tile_cols is None:
        for tm in row_cands:
            if _vmem_estimate(tm, d_out_p, d_in, d_out_p, x_itemsize,
                              w_itemsize, out_itemsize, True) <= budget:
                if tile_rows is None and rows >= 256 and rows <= tm:
                    # Split into >=2 row tiles so both v7x TensorCores get
                    # work; free here since W is DMA'd once regardless.
                    tm = max(128, _round_up((rows + 1) // 2, 128))
                return tm, d_out_p, True

    # Path 2: column-tiled W.  Biggest TM first (W HBM traffic ~ rows / TM),
    # then biggest TN (fewer j steps, fewer re-reads of the normed scratch).
    if tile_cols is not None:
        col_cands = (tile_cols,)
    else:
        col_cands = tuple(t for t in (1024, 512, 256, 128)
                          if d_out_p % t == 0) or (d_out_p,)
    for tm in row_cands:
        for tn in col_cands:
            if _vmem_estimate(tm, tn, d_in, d_out_p, x_itemsize, w_itemsize,
                              out_itemsize, False) <= budget:
                return tm, tn, False
    return row_cands[-1], col_cands[-1], False  # best effort


# ----------------------------------------------------------------------------
# Wrapper
# ----------------------------------------------------------------------------
def prenorm_linear(x, gamma, beta, w, bias, *, tile_rows=None, tile_cols=None,
                   allow_full_weight=True, matmul_dtype=None):
    """y = LayerNorm(x) @ W + b   (PreNorm with fn = Linear).

    x: [..., D_in]; gamma, beta: [D_in]; w: [D_in, D_out]; bias: [D_out].
    matmul_dtype: optional dtype (e.g. jnp.bfloat16) for the MXU operands when
    the weight is stored in f32; LayerNorm stats / accumulation stay f32.
    """
    orig_shape = x.shape
    d_in = orig_shape[-1]
    d_w_in, d_out = w.shape
    assert d_in == d_w_in, "weight must be (D_in, D_out); transpose PyTorch weights"

    rows = 1
    for s in orig_shape[:-1]:
        rows *= s
    x2 = x.reshape(rows, d_in)
    gamma2 = gamma.reshape(1, d_in)
    beta2 = beta.reshape(1, d_in)

    if matmul_dtype is not None and jnp.dtype(matmul_dtype) != w.dtype:
        w = w.astype(matmul_dtype)   # full-rate MXU operands when requested

    out_dtype = x.dtype
    x_itemsize = jnp.dtype(x.dtype).itemsize
    w_itemsize = jnp.dtype(w.dtype).itemsize
    out_itemsize = jnp.dtype(out_dtype).itemsize

    # Lane-dense output: pad D_out to a multiple of 128 (unmasked vst).
    d_out_p = _round_up(d_out, 128)
    if d_out_p != d_out:
        w = jnp.pad(w, ((0, 0), (0, d_out_p - d_out)))
        bias = jnp.pad(bias, ((0, d_out_p - d_out),))
    bias2 = bias.reshape(1, d_out_p)

    budget = _vmem_budget_bytes()
    tm, tn, full_w = _choose_config(rows, d_in, d_out_p, x_itemsize, w_itemsize,
                                    out_itemsize, budget, tile_rows, tile_cols,
                                    allow_full_weight)

    # Pad ragged row counts so LayerNorm never runs on undefined rows.
    rows_p = _round_up(rows, tm)
    if rows_p != rows:
        x2 = jnp.pad(x2, ((0, rows_p - rows), (0, 0)))
    n_row_tiles = rows_p // tm

    # Roofline hint for the surrounding XLA graph (counts repeated W streams).
    w_passes = 1 if full_w else n_row_tiles
    cost = pl.CostEstimate(
        flops=2 * rows * d_in * d_out + 8 * rows * d_in,
        transcendentals=rows,                      # one rsqrt per token row
        bytes_accessed=int(rows_p * d_in * x_itemsize
                           + w_passes * d_in * d_out_p * w_itemsize
                           + rows_p * d_out_p * out_itemsize
                           + 2 * d_in * 4 + 2 * d_out_p * 4),
    )
    compiler_params = pltpu.CompilerParams(
        dimension_semantics=("parallel",) if full_w else ("parallel", "arbitrary"),
        vmem_limit_bytes=budget,
    )

    if full_w:
        out2 = pl.pallas_call(
            _prenorm_linear_full_w_kernel,
            out_shape=jax.ShapeDtypeStruct((rows_p, d_out_p), out_dtype),
            grid_spec=pltpu.PrefetchScalarGridSpec(
                num_scalar_prefetch=0,
                grid=(n_row_tiles,),
                in_specs=[
                    pl.BlockSpec((tm, d_in), lambda i: (i, 0)),       # x row tile
                    pl.BlockSpec((1, d_in), lambda i: (0, 0)),        # gamma
                    pl.BlockSpec((1, d_in), lambda i: (0, 0)),        # beta
                    pl.BlockSpec((d_in, d_out_p), lambda i: (0, 0)),  # W (resident, 1 DMA)
                    pl.BlockSpec((1, d_out_p), lambda i: (0, 0)),     # bias
                ],
                out_specs=pl.BlockSpec((tm, d_out_p), lambda i: (i, 0)),
            ),
            compiler_params=compiler_params,
            cost_estimate=cost,
        )(x2, gamma2, beta2, w, bias2)
    else:
        out2 = pl.pallas_call(
            _prenorm_linear_tiled_kernel,
            out_shape=jax.ShapeDtypeStruct((rows_p, d_out_p), out_dtype),
            grid_spec=pltpu.PrefetchScalarGridSpec(
                num_scalar_prefetch=0,
                grid=(n_row_tiles, pl.cdiv(d_out_p, tn)),
                in_specs=[
                    pl.BlockSpec((tm, d_in), lambda i, j: (i, 0)),    # x (resident over j)
                    pl.BlockSpec((1, d_in), lambda i, j: (0, 0)),     # gamma
                    pl.BlockSpec((1, d_in), lambda i, j: (0, 0)),     # beta
                    pl.BlockSpec((d_in, tn), lambda i, j: (0, j)),    # W column tile
                    pl.BlockSpec((1, tn), lambda i, j: (0, j)),       # bias tile
                ],
                out_specs=pl.BlockSpec((tm, tn), lambda i, j: (i, j)),
                scratch_shapes=[pltpu.VMEM((tm, d_in), w.dtype)],     # cached LayerNorm(x)
            ),
            compiler_params=compiler_params,
            cost_estimate=cost,
        )(x2, gamma2, beta2, w, bias2)

    if rows_p != rows:
        out2 = out2[:rows]
    if d_out_p != d_out:
        out2 = out2[:, :d_out]
    return out2.reshape(orig_shape[:-1] + (d_out,))


# ----------------------------------------------------------------------------
# Reference (mirrors kernel numerics) and self-test
# ----------------------------------------------------------------------------
def _reference(x, gamma, beta, w, bias, *, matmul_dtype=None):
    d_in = x.shape[-1]
    xf = x.astype(jnp.float32)
    mean = jnp.mean(xf, axis=-1, keepdims=True)
    var = jnp.mean((xf - mean) ** 2, axis=-1, keepdims=True)
    normed = (xf - mean) * lax.rsqrt(var + _LN_EPS)
    normed = normed * gamma.astype(jnp.float32) + beta.astype(jnp.float32)
    wm = w.astype(matmul_dtype) if matmul_dtype is not None else w
    normed = normed.astype(wm.dtype)
    prec = lax.Precision.HIGHEST if wm.dtype == jnp.float32 else None
    y = jnp.dot(normed.reshape(-1, d_in), wm,
                preferred_element_type=jnp.float32, precision=prec)
    y = y + bias.astype(jnp.float32)
    return y.reshape(x.shape[:-1] + (w.shape[1],)).astype(x.dtype)


if __name__ == "__main__":
    key = jax.random.PRNGKey(0)
    kx, kg, kb, kw, kbias, kx2 = jax.random.split(key, 6)

    # --- Test 1: f32, full-weight-resident path (default). ---
    B, N, D = 2, 8, 128
    x = jax.random.normal(kx, (B, N, D), dtype=jnp.float32)
    gamma = 1.0 + 0.1 * jax.random.normal(kg, (D,), dtype=jnp.float32)
    beta = 0.1 * jax.random.normal(kb, (D,), dtype=jnp.float32)
    w = jax.random.normal(kw, (D, D), dtype=jnp.float32) / jnp.sqrt(D)  # (D_in, D_out)
    bias = 0.1 * jax.random.normal(kbias, (D,), dtype=jnp.float32)

    out = jax.block_until_ready(prenorm_linear(x, gamma, beta, w, bias))
    ref = _reference(x, gamma, beta, w, bias)
    assert out.shape == (B, N, D)
    assert jnp.allclose(out, ref, atol=1e-2, rtol=1e-2), "f32 full-W mismatch"

    # --- Test 2: bf16, forced column-tiled path (exercises j==0 normed cache). ---
    D2 = 256
    xb = jax.random.normal(kx2, (B, N, D2), dtype=jnp.bfloat16)
    gb = (1.0 + 0.1 * jax.random.normal(kg, (D2,))).astype(jnp.bfloat16)
    bb = (0.1 * jax.random.normal(kb, (D2,))).astype(jnp.bfloat16)
    wb = (jax.random.normal(kw, (D2, D2)) / jnp.sqrt(D2)).astype(jnp.bfloat16)
    biasb = (0.1 * jax.random.normal(kbias, (D2,))).astype(jnp.bfloat16)

    outb = jax.block_until_ready(
        prenorm_linear(xb, gb, bb, wb, biasb,
                       allow_full_weight=False, tile_cols=128))
    refb = _reference(xb, gb, bb, wb, biasb)
    assert outb.shape == (B, N, D2)
    assert jnp.allclose(outb.astype(jnp.float32), refb.astype(jnp.float32),
                        atol=5e-2, rtol=5e-2), "bf16 tiled mismatch"

    # --- Test 3: ragged row count (wrapper zero-pads rows to a tile multiple). ---
    xr = jax.random.normal(kx, (1, 200, D), dtype=jnp.float32)
    outr = jax.block_until_ready(
        prenorm_linear(xr, gamma, beta, w, bias, tile_rows=128))
    refr = _reference(xr, gamma, beta, w, bias)
    assert outr.shape == (1, 200, D)
    assert jnp.allclose(outr, refr, atol=1e-2, rtol=1e-2), "ragged-rows mismatch"

    # --- Test 4: f32 inputs with bf16 MXU operands (matmul_dtype flag). ---
    outc = jax.block_until_ready(
        prenorm_linear(x, gamma, beta, w, bias, matmul_dtype=jnp.bfloat16))
    refc = _reference(x, gamma, beta, w, bias, matmul_dtype=jnp.bfloat16)
    assert jnp.allclose(outc, refc, atol=5e-2, rtol=5e-2), "bf16-matmul mismatch"

    print("KERNEL_OK")
</pallas_src>

<mosaic_0001>
module attributes {stable_mosaic.version = 11 : i64} {
  func.func @_prenorm_linear_full_w_kernel(%arg0: i32, %arg1: memref<16x128xf32, #tpu.memory_space<vmem>>, %arg2: memref<1x128xf32, #tpu.memory_space<vmem>>, %arg3: memref<1x128xf32, #tpu.memory_space<vmem>>, %arg4: memref<128x128xf32, #tpu.memory_space<vmem>>, %arg5: memref<1x128xf32, #tpu.memory_space<vmem>>, %arg6: memref<16x128xf32, #tpu.memory_space<vmem>>) attributes {dimension_semantics = [#tpu.dimension_semantics<parallel>], iteration_bounds = array<i64: 1>, scalar_prefetch = 0 : i64, scratch_operands = 0 : i64, tpu.core_type = #tpu.core_type<tc>, window_params = [{transform_indices = @transform_0, window_bounds = array<i64: 16, 128>}, {pipeline_mode = #tpu.pipeline_mode<synchronous>, transform_indices = @transform_1, window_bounds = array<i64: 1, 128>}, {pipeline_mode = #tpu.pipeline_mode<synchronous>, transform_indices = @transform_2, window_bounds = array<i64: 1, 128>}, {pipeline_mode = #tpu.pipeline_mode<synchronous>, transform_indices = @transform_3, window_bounds = array<i64: 128, 128>}, {pipeline_mode = #tpu.pipeline_mode<synchronous>, transform_indices = @transform_4, window_bounds = array<i64: 1, 128>}, {transform_indices = @transform_5, window_bounds = array<i64: 16, 128>}]} {
    %c0 = arith.constant 0 : index
    %c0_0 = arith.constant 0 : index
    %0 = vector.load %arg1[%c0, %c0_0] : memref<16x128xf32, #tpu.memory_space<vmem>>, vector<16x128xf32>
    %cst = arith.constant dense<0.000000e+00> : vector<16xf32>
    %1 = vector.multi_reduction <add>, %0, %cst [1] : vector<16x128xf32> to vector<16xf32>
    %2 = vector.shape_cast %1 : vector<16xf32> to vector<16x1xf32>
    %cst_1 = arith.constant 1.280000e+02 : f32
    %3 = vector.broadcast %cst_1 : f32 to vector<16x1xf32>
    %4 = arith.divf %2, %3 : vector<16x1xf32>
    %5 = vector.broadcast %4 : vector<16x1xf32> to vector<16x128xf32>
    %6 = arith.subf %0, %5 : vector<16x128xf32>
    %7 = arith.mulf %6, %6 : vector<16x128xf32>
    %cst_2 = arith.constant dense<0.000000e+00> : vector<16xf32>
    %8 = vector.multi_reduction <add>, %7, %cst_2 [1] : vector<16x128xf32> to vector<16xf32>
    %9 = vector.shape_cast %8 : vector<16xf32> to vector<16x1xf32>
    %cst_3 = arith.constant 1.280000e+02 : f32
    %10 = vector.broadcast %cst_3 : f32 to vector<16x1xf32>
    %11 = arith.divf %9, %10 : vector<16x1xf32>
    %cst_4 = arith.constant 9.99999974E-6 : f32
    %12 = vector.broadcast %cst_4 : f32 to vector<16x1xf32>
    %13 = arith.addf %11, %12 : vector<16x1xf32>
    %14 = math.rsqrt %13 : vector<16x1xf32>
    %15 = vector.broadcast %14 : vector<16x1xf32> to vector<16x128xf32>
    %16 = arith.mulf %6, %15 : vector<16x128xf32>
    %c0_5 = arith.constant 0 : index
    %c0_6 = arith.constant 0 : index
    %17 = vector.load %arg2[%c0_5, %c0_6] : memref<1x128xf32, #tpu.memory_space<vmem>>, vector<1x128xf32>
    %18 = vector.broadcast %17 : vector<1x128xf32> to vector<16x128xf32>
    %19 = arith.mulf %16, %18 : vector<16x128xf32>
    %c0_7 = arith.constant 0 : index
    %c0_8 = arith.constant 0 : index
    %20 = vector.load %arg3[%c0_7, %c0_8] : memref<1x128xf32, #tpu.memory_space<vmem>>, vector<1x128xf32>
    %21 = vector.broadcast %20 : vector<1x128xf32> to vector<16x128xf32>
    %22 = arith.addf %19, %21 : vector<16x128xf32>
    %c0_9 = arith.constant 0 : index
    %c0_10 = arith.constant 0 : index
    %23 = vector.load %arg4[%c0_9, %c0_10] : memref<128x128xf32, #tpu.memory_space<vmem>>, vector<128x128xf32>
    %cst_11 = arith.constant dense<0.000000e+00> : vector<16x128xf32>
    %24 = tpu.matmul %22, %23, %cst_11 {dimension_numbers = #tpu.dot_dimension_numbers<[1], [0], [0], [1], [0, 0, 1, 1], [], []>} : vector<16x128xf32>, vector<128x128xf32>, vector<16x128xf32> -> vector<16x128xf32>
    %c0_12 = arith.constant 0 : index
    %c0_13 = arith.constant 0 : index
    %25 = vector.load %arg5[%c0_12, %c0_13] : memref<1x128xf32, #tpu.memory_space<vmem>>, vector<1x128xf32>
    %26 = vector.broadcast %25 : vector<1x128xf32> to vector<16x128xf32>
    %27 = arith.addf %24, %26 : vector<16x128xf32>
    %c0_14 = arith.constant 0 : index
    %c0_15 = arith.constant 0 : index
    %28 = vector.load %arg6[%c0_14, %c0_15] : memref<16x128xf32, #tpu.memory_space<vmem>>, vector<16x128xf32>
    tpu.vector_store %arg6[%c0_14, %c0_15], %27 {strides = array<i32>} : memref<16x128xf32, #tpu.memory_space<vmem>>, vector<16x128xf32>,
    return
  }
  func.func @transform_0(%arg0: i32) -> (i32, i32) {
    %c0_i32 = arith.constant 0 : i32
    %c0_i32_0 = arith.constant 0 : i32
    return %arg0, %c0_i32 : i32, i32
  }
  func.func @transform_1(%arg0: i32) -> (i32, i32) {
    %c0_i32 = arith.constant 0 : i32
    %c0_i32_0 = arith.constant 0 : i32
    %c0_i32_1 = arith.constant 0 : i32
    return %c0_i32, %c0_i32_0 : i32, i32
  }
  func.func @transform_2(%arg0: i32) -> (i32, i32) {
    %c0_i32 = arith.constant 0 : i32
    %c0_i32_0 = arith.constant 0 : i32
    %c0_i32_1 = arith.constant 0 : i32
    return %c0_i32, %c0_i32_0 : i32, i32
  }
  func.func @transform_3(%arg0: i32) -> (i32, i32) {
    %c0_i32 = arith.constant 0 : i32
    %c0_i32_0 = arith.constant 0 : i32
    %c0_i32_1 = arith.constant 0 : i32
    return %c0_i32, %c0_i32_0 : i32, i32
  }
  func.func @transform_4(%arg0: i32) -> (i32, i32) {
    %c0_i32 = arith.constant 0 : i32
    %c0_i32_0 = arith.constant 0 : i32
    %c0_i32_1 = arith.constant 0 : i32
    return %c0_i32, %c0_i32_0 : i32, i32
  }
  func.func @transform_5(%arg0: i32) -> (i32, i32) {
    %c0_i32 = arith.constant 0 : i32
    %c0_i32_0 = arith.constant 0 : i32
    return %arg0, %c0_i32 : i32, i32
  }
}

</mosaic_0001>

<bundles_post_ra>
// kernel: tpu_custom_call.1
= control target key start
LH: loop header
LB: loop body
LE: loop exit
PB: predicated region body
PF: predicated region fallthrough
CT: control target
= control target key end

     0   :  { %10 = vsyncpa [#allocation3], 0  ;;  %s468_s0 = inlined_call_operand.hbm [shape: f32[16,128], index: 0, kind: input, shape index: {}]   ;;  %s469_s1 = inlined_call_operand.vmem [shape: f32[1,128], index: 1, kind: input, shape index: {}]   ;;  %s470_s2 = inlined_call_operand.vmem [shape: f32[1,128], index: 2, kind: input, shape index: {}]   ;;  %s471_s3 = inlined_call_operand.hbm [shape: f32[128,128], index: 3, kind: input, shape index: {}]   ;;  %s472_s4 = inlined_call_operand.vmem [shape: f32[1,128], index: 4, kind: input, shape index: {}]   ;;  %s473_s5 = inlined_call_operand.hbm [shape: f32[16,128], index: 5, kind: output, shape index: {}]  }
   0x1   :  { %11 = vsyncpa [#allocation6], 0 }
   0x2   :  { %12 = vsyncpa [#allocation4], 0  ;;  %s379_s18 = smov [#allocation2]   ;;  %s307_s22 = scalar_lea.hbm %s468_s0, 256 }
   0x3   :  { %s18_s19 = sshll.u32 %s379_s18, 4  ;;  %p308_p0 = scmp.ne.s32.totalorder %s468_s0, %s307_s22  ;;  %s19_s19 = int_to_ptr.vmem [resolvable:$true] %s18_s19 }
   0x4   :  { %p311_p1 = scmp.lt.u32.totalorder %s307_s22, %s468_s0 }
   0x6   :  { %p313_p2 = pnand %p311_p1, %p308_p0 }
   0x8   :  { %316 = shalt.err (!%p313_p2)
}
   0x9   :  { %s317_s27 = scalar_lea.vmem %s19_s19, 256  ;;  %p322_p4 = scmp.lt.s32.totalorder %s19_s19, %s19_s19 }
   0xa   :  { %p318_p3 = scmp.ne.s32.totalorder %s19_s19, %s317_s27  ;;  %p323_p5 = scmp.lt.s32.totalorder %s317_s27, %s317_s27 }
   0xc   :  { %p324_p6 = por %p323_p5, %p322_p4 }
   0xe   :  { %p325_p7 = pnand %p324_p6, %p318_p3 }
  0x10   :  { %328 = shalt.err (!%p325_p7)
}
  0x11   :  { %s380_s28 = smov 128   ;;  %s381_s29 = smov 8  }
  0x12   :  { %24 = dma.hbm_to_vmem [thread:$0]  %s468_s0, 256, %s19_s19, [#allocation3], %s380_s28, %s380_s28, %s381_s29  }
  0x13   :  { %s382_s7 = smov [#allocation5]   ;;  %s329_s11 = scalar_lea.hbm %s471_s3, 2048 }
  0x14   :  { %s34_s8 = sshll.u32 %s382_s7, 4  ;;  %p330_p8 = scmp.ne.s32.totalorder %s471_s3, %s329_s11  ;;  %s35_s8 = int_to_ptr.vmem [resolvable:$true] %s34_s8 }
  0x15   :  { %p333_p9 = scmp.lt.u32.totalorder %s329_s11, %s471_s3 }
  0x17   :  { %p335_p10 = pnand %p333_p9, %p330_p8 }
  0x19   :  { %338 = shalt.err (!%p335_p10)
}
  0x1a   :  { %s339_s16 = scalar_lea.vmem %s35_s8, 2048  ;;  %p344_p12 = scmp.lt.s32.totalorder %s35_s8, %s35_s8 }
  0x1b   :  { %p340_p11 = scmp.ne.s32.totalorder %s35_s8, %s339_s16  ;;  %p345_p13 = scmp.lt.s32.totalorder %s339_s16, %s339_s16 }
  0x1d   :  { %p346_p0 = por %p345_p13, %p344_p12 }
  0x1f   :  { %p347_p1 = pnand %p346_p0, %p340_p11 }
  0x21   :  { %350 = shalt.err (!%p347_p1)
}
  0x22   :  { %40 = dma.hbm_to_vmem [thread:$0]  %s471_s3, 2048, %s35_s8, [#allocation6], %s380_s28, %s380_s28, %s381_s29  }
  0x23   :  { %373 = dma.done.wait [#allocation3], 256  }
  0x24   :  { %374 = vsyncadd [#allocation3], 4294967040 }
  0x25   :  { %375 = dma.done.wait [#allocation6], 2048  }
  0x26   :  { %376 = vsyncadd [#allocation6], 4294965248  ;;  %v49_v0 = vld [vmem:[#allocation2] sm:$0xff]  ;;  %v50_v1 = vld [vmem:[#allocation2 + $0x8] sm:$0xff]  ;;  %s383_s23 = smov [#allocation7]  }
  0x27   :  { %51 = vadd.xlane.f32.xlu0 %v49_v0  ;;  %v92_v2 = vld [vmem:[#allocation5] sm:$0xff]  ;;  %v93_v3 = vld [vmem:[#allocation5 + $0x8] sm:$0xff]  ;;  %v94_v4 = vld [vmem:[#allocation5 + $0x10] sm:$0xff]  ;;  %s197_s24 = sshll.u32 %s383_s23, 4  ;;  %s198_s24 = int_to_ptr.vmem [resolvable:$true] %s197_s24 }
  0x28   :  { %v266_v5 = vpack.c.bf16 %v93_v3, %v92_v2  ;;  %v95_v6 = vld [vmem:[#allocation5 + $0x18] sm:$0xff]  ;;  %v96_v16 = vld [vmem:[#allocation5 + $0x20] sm:$0xff]  ;;  %v97_v17 = vld [vmem:[#allocation5 + $0x28] sm:$0xff]  ;;  %p356_p3 = scmp.lt.s32.totalorder %s198_s24, %s198_s24 }
  0x29   :  { %v270_v7 = vpack.c.bf16 %v95_v6, %v94_v4  ;;  %v274_v18 = vpack.c.bf16 %v97_v17, %v96_v16  ;;  %v98_v19 = vld [vmem:[#allocation5 + $0x30] sm:$0xff]  ;;  %v99_v20 = vld [vmem:[#allocation5 + $0x38] sm:$0xff]  ;;  %v100_v22 = vld [vmem:[#allocation5 + $0x40] sm:$0xff] }
  0x2a   :  { %267 = vmatprep.subr.bf16.mxu0 %v266_v5  ;;  %v278_v21 = vpack.c.bf16 %v99_v20, %v98_v19  ;;  %v101_v23 = vld [vmem:[#allocation5 + $0x48] sm:$0xff]  ;;  %v102_v25 = vld [vmem:[#allocation5 + $0x50] sm:$0xff]  ;;  %v103_v26 = vld [vmem:[#allocation5 + $0x58] sm:$0xff] }
  0x2b   :  { %53 = vadd.xlane.f32.xlu0 %v50_v1  ;;  %269 = vmatpush3.bf16.msra.mxu0 %v266_v5  ;;  %v282_v24 = vpack.c.bf16 %v101_v23, %v100_v22  ;;  %v104_v27 = vld [vmem:[#allocation5 + $0x60] sm:$0xff]  ;;  %v286_v28 = vpack.c.bf16 %v103_v26, %v102_v25  ;;  %v105_v29 = vld [vmem:[#allocation5 + $0x68] sm:$0xff]  ;;  %v106_v31 = vld [vmem:[#allocation5 + $0x70] sm:$0xff] }
  0x2c   :  { %271 = vmatprep.subr.bf16.mxu0 %v270_v7  ;;  %v290_v30 = vpack.c.bf16 %v105_v29, %v104_v27  ;;  %v107_v32 = vld [vmem:[#allocation5 + $0x78] sm:$0xff]  ;;  %v210_v41 = vld [vmem:[%s469_s1] ss:$0 sm:$0xff]  ;;  %s351_s1 = scalar_lea.vmem %s198_s24, 256 }
  0x2d   :  { %v294_v33 = vpack.c.bf16 %v107_v32, %v106_v31  ;;  %v211_v43 = vld [vmem:[%s470_s2] ss:$0 sm:$0xff]  ;;  %p352_p2 = scmp.ne.s32.totalorder %s198_s24, %s351_s1  ;;  %p357_p4 = scmp.lt.s32.totalorder %s351_s1, %s351_s1 }
  0x2e   :  { %v212_v50 = vld [vmem:[%s472_s4] ss:$0 sm:$0xff] }
  0x2f   :  { %273 = vmatpush3.bf16.msra.mxu0 %v270_v7  ;;  %p358_p5 = por %p357_p4, %p356_p3 }
  0x30   :  { %275 = vmatprep.subr.bf16.mxu0 %v274_v18 }
  0x31   :  { %p359_p6 = pnand %p358_p5, %p352_p2 }
  0x33   :  { %277 = vmatpush3.bf16.msra.mxu0 %v274_v18 }
  0x34   :  { %279 = vmatprep.subr.bf16.mxu0 %v278_v21 }
  0x37   :  { %281 = vmatpush3.bf16.msra.mxu0 %v278_v21 }
  0x38   :  { %283 = vmatprep.subr.bf16.mxu0 %v282_v24 }
  0x3b   :  { %285 = vmatpush3.bf16.msra.mxu0 %v282_v24 }
  0x3c   :  { %287 = vmatprep.subr.bf16.mxu0 %v286_v28 }
  0x3f   :  { %289 = vmatpush3.bf16.msra.mxu0 %v286_v28 }
  0x40   :  { %291 = vmatprep.subr.bf16.mxu0 %v290_v30 }
  0x43   :  { %293 = vmatpush3.bf16.msra.mxu0 %v290_v30 }
  0x44   :  { %295 = vmatprep.subr.bf16.mxu0 %v294_v33 }
  0x47   :  { %297 = vmatpush3.bf16.msra.mxu0 %v294_v33 }
  0xb4   :  { %v52_v8 = vpop.xlane.xlu0 %51 }
  0xb5   :  { %v56_v9 = vmul.f32 0.0078125, %v52_v8 }
  0xb7   :  { %v58_v10 = vsub.f32 %v49_v0, %v56_v9 }
  0xb8   :  { %v54_v11 = vpop.xlane.xlu0 %53 }
  0xb9   :  { %v57_v12 = vmul.f32 0.0078125, %v54_v11  ;;  %v60_v13 = vmul.f32 %v58_v10, %v58_v10 }
  0xbb   :  { %v59_v14 = vsub.f32 %v50_v1, %v57_v12  ;;  %62 = vadd.xlane.f32.xlu1 %v60_v13 }
  0xbd   :  { %v61_v15 = vmul.f32 %v59_v14, %v59_v14 }
  0xbf   :  { %64 = vadd.xlane.f32.xlu1 %v61_v15 }
 0x148   :  { %v63_v34 = vpop.xlane.xlu1 %62 }
 0x149   :  { %v66_v35 = vmul.f32 0.0078125, %v63_v34 }
 0x14b   :  { %v68_v36 = vadd.f32 1e-05, %v66_v35 }
 0x14c   :  { %v65_v37 = vpop.xlane.xlu1 %64 }
 0x14d   :  { %303 = vrsqrt.f32 %v68_v36  ;;  %v67_v38 = vmul.f32 0.0078125, %v65_v37 }
 0x14f   :  { %v69_v39 = vadd.f32 1e-05, %v67_v38 }
 0x151   :  { %305 = vrsqrt.f32 %v69_v39 }
 0x157   :  { %v304_v40 = vpop.eup %303 }
 0x158   :  { %v72_v42 = vmul.f32 %v304_v40, %v58_v10 }
 0x15a   :  { %v81_v44 = vmul.f32 %v210_v41, %v72_v42 }
 0x15b   :  { %v306_v45 = vpop.eup %305 }
 0x15c   :  { %v73_v46 = vmul.f32 %v306_v45, %v59_v14  ;;  %v90_v47 = vadd.f32 %v211_v43, %v81_v44 }
 0x15e   :  { %v82_v48 = vmul.f32 %v210_v41, %v73_v46  ;;  %263 = vmatprep.mubr.f32.mxu0 %v90_v47 }
 0x160   :  { %v91_v49 = vadd.f32 %v211_v43, %v82_v48 }
 0x162   :  { %264 = vmatmul.mubr.f32.vlgmr.msra.gmra.mrb[0].mxu0 %v91_v49 }
 0x235   :  { %v265_v51 = vpop.f32.mrb[0].mxu0 }
 0x236   :  { %v187_v52 = vadd.f32 %v265_v51, %v212_v50  ;;  %v181_v53 = vpop.f32.mrb[1].mxu0 }
 0x237   :  { %v182_v54 = vadd.f32 %v212_v50, %v181_v53 }
 0x238   :  { %191 = vst [vmem:[#allocation7 + $0x8] sm:$0xff] %v187_v52 }
 0x239   :  { %190 = vst [vmem:[#allocation7] sm:$0xff] %v182_v54 }
 0x23a   :  { %362 = shalt.err (!%p359_p6)
}
 0x23b   :  { %s363_s4 = scalar_lea.hbm %s473_s5, 256 }
 0x23c   :  { %p364_p7 = scmp.ne.s32.totalorder %s473_s5, %s363_s4  ;;  %p367_p8 = scmp.lt.u32.totalorder %s363_s4, %s473_s5 }
 0x23e   :  { %p369_p9 = pnand %p367_p8, %p364_p7 }
 0x240   :  { %372 = shalt.err (!%p369_p9)
}
 0x241   :  { %203 = dma.vmem_to_hbm [thread:$0]  %s198_s24, 256, %s473_s5, [#allocation4], %s380_s28, %s380_s28, %s381_s29  }
 0x242   :  { %377 = dma.done.wait [#allocation4], 256  }
 0x243   :  { %378 = vsyncadd [#allocation4], 4294967040 }
 0x244   :  { %207 = vsyncpa [#allocation3], 1 }
 0x245   :  { %208 = vsyncpa [#allocation6], 1 }
 0x246   :  { %209 = vsyncpa [#allocation4], 1 }

</bundles_post_ra>
